<compile_context>
chip_gen: v6e
topology: v6e:2x2x1
jax: 0.10.0
libtpu: 0.0.40
codegen_flags: <defaults>
</compile_context>

<pallas_src>
import functools
import math

import jax
import jax.numpy as jnp
from jax.experimental import pallas as pl
from jax.experimental.pallas import tpu as pltpu


# --------------------------- per-generation config ---------------------------

def _tpu_config():
    """Tile / scoped-VMEM defaults derived from the detected TPU generation.

    v5e/v6e (128 MiB VMEM): big tiles + 96 MiB scoped limit (review item).
    v7x (64 MiB VMEM per TC) or unknown: conservative tiles + 40 MiB limit.
    """
    vmem_cap = None
    try:
        vmem_cap = getattr(pltpu.get_tpu_info(), "vmem_capacity_bytes", None)
    except Exception:
        vmem_cap = None
    if vmem_cap is not None and vmem_cap > (96 << 20):      # v5e / v6e class
        return dict(tm=512, tn=512, tk=1024, vmem_limit=96 << 20)
    return dict(tm=256, tn=256, tk=512, vmem_limit=40 << 20)  # v7x / unknown


_CFG = _tpu_config()


def _round_up(x, m):
    return (x + m - 1) // m * m


def _choose_tk(K, target):
    """Largest multiple of 128 <= target that divides K; full K otherwise."""
    if K <= target or K % 128 != 0:
        return K                      # full-K block (equal-to-array-dim is legal)
    t = (target // 128) * 128
    while K % t != 0:
        t -= 128
    return t


def _choose_tq(S, target=512):
    """Query-tile size: largest multiple of 8 <= target dividing S; else full S."""
    if S <= target or S % 8 != 0:
        return S
    t = (target // 8) * 8
    while S % t != 0:
        t -= 8
    return t


# ------------------------- fused LN + matmul kernel -------------------------

def _fused_linear_kernel(*refs, activation, has_bias, has_ln, has_res):
    # ref order: x, w, [gamma, beta], [bias], [residual], out, acc, [ln_cache]
    it = iter(refs)
    x_ref = next(it)
    w_ref = next(it)
    if has_ln:
        g_ref = next(it)
        b2_ref = next(it)
    if has_bias:
        bias_ref = next(it)
    if has_res:
        res_ref = next(it)
    o_ref = next(it)
    acc_ref = next(it)
    xln_ref = next(it) if has_ln else None

    j = pl.program_id(1)
    k = pl.program_id(2)

    @pl.when(k == 0)
    def _():
        acc_ref[...] = jnp.zeros_like(acc_ref)

    if has_ln:
        # LayerNorm prologue over the full K row (tk == K).  Computed once per
        # row block (first column tile) and cached in VMEM so it is NOT redone
        # for every output column tile (perf-review item).
        @pl.when(j == 0)
        def _():
            xf = x_ref[...].astype(jnp.float32)
            mu = jnp.mean(xf, axis=-1, keepdims=True)
            var = jnp.mean(jnp.square(xf - mu), axis=-1, keepdims=True)
            y = (xf - mu) * jax.lax.rsqrt(var + 1e-5) * g_ref[...] + b2_ref[...]
            xln_ref[...] = y.astype(jnp.bfloat16)
        x = xln_ref[...]
    else:
        x = x_ref[...].astype(jnp.bfloat16)

    acc_ref[...] += jnp.dot(x, w_ref[...], preferred_element_type=jnp.float32)

    @pl.when(k == pl.num_programs(2) - 1)
    def _():
        y = acc_ref[...]
        if has_bias:
            y = y + bias_ref[...]
        if activation == "gelu":
            # TODO(synk): MLP_small undefined in the reference; tanh-GELU assumed
            # (PyTorch nn.GELU default is exact erf).
            y = jax.nn.gelu(y)
        if has_res:
            y = y + res_ref[...].astype(jnp.float32)
        o_ref[...] = y.astype(o_ref.dtype)


def fused_linear(x2d, w, bias=None, ln=None, residual=None, activation="none",
                 out_dtype=jnp.float32):
    """y = [residual + ] act( LN?(x2d) @ w + bias ), tiled bf16-MXU matmul.

    x2d: (M, K) f32/bf16; w: (K, N) (cast to bf16); bias: (1, N)/(N,) f32;
    ln: (gamma, beta); residual: (M, N) f32.  M and N are padded to
    sublane/lane-friendly multiples and the result sliced back, so narrow
    outputs (small vocab) never hit masked stores or full-dim tile fallbacks.
    """
    M, K = x2d.shape
    Kw, N = w.shape
    assert Kw == K
    has_ln = ln is not None

    tm_t, tn_t, tk_t = _CFG["tm"], _CFG["tn"], _CFG["tk"]
    Mp = _round_up(M, tm_t if M > tm_t else 8)
    Np = _round_up(N, tn_t if N > tn_t else 128)
    tm = min(tm_t, Mp)
    tn = min(tn_t, Np)
    tk = K if has_ln else _choose_tk(K, tk_t)   # LN needs the full row

    w = w.astype(jnp.bfloat16)
    if Np != N:
        w = jnp.pad(w, ((0, 0), (0, Np - N)))
    if Mp != M:
        x2d = jnp.pad(x2d, ((0, Mp - M), (0, 0)))

    gm, gn, gk = Mp // tm, Np // tn, K // tk

    in_specs = [pl.BlockSpec((tm, tk), lambda i, j, k: (i, k)),
                pl.BlockSpec((tk, tn), lambda i, j, k: (k, j))]
    args = [x2d, w]
    if has_ln:
        gamma, beta = ln
        in_specs += [pl.BlockSpec((1, tk), lambda i, j, k: (0, k)),
                     pl.BlockSpec((1, tk), lambda i, j, k: (0, k))]
        args += [gamma.reshape(1, K).astype(jnp.float32),
                 beta.reshape(1, K).astype(jnp.float32)]
    if bias is not None:
        b = bias.reshape(1, N).astype(jnp.float32)
        if Np != N:
            b = jnp.pad(b, ((0, 0), (0, Np - N)))
        in_specs.append(pl.BlockSpec((1, tn), lambda i, j, k: (0, j)))
        args.append(b)
    if residual is not None:
        r = residual.astype(jnp.float32)
        if Mp != M or Np != N:
            r = jnp.pad(r, ((0, Mp - M), (0, Np - N)))
        in_specs.append(pl.BlockSpec((tm, tn), lambda i, j, k: (i, j)))
        args.append(r)

    scratch = [pltpu.VMEM((tm, tn), jnp.float32)]
    if has_ln:
        scratch.append(pltpu.VMEM((tm, K), jnp.bfloat16))   # cached LN'd rows (bf16)

    kern = functools.partial(_fused_linear_kernel, activation=activation,
                             has_bias=bias is not None, has_ln=has_ln,
                             has_res=residual is not None)
    out = pl.pallas_call(
        kern,
        grid=(gm, gn, gk),
        in_specs=in_specs,
        out_specs=pl.BlockSpec((tm, tn), lambda i, j, k: (i, j)),
        out_shape=jax.ShapeDtypeStruct((Mp, Np), out_dtype),
        scratch_shapes=scratch,
        compiler_params=pltpu.CompilerParams(
            # Keep the column axis "arbitrary" when the LN row-cache is reused
            # across column tiles (must not be split across cores).
            dimension_semantics=("parallel",
                                 "arbitrary" if has_ln else "parallel",
                                 "arbitrary"),
            vmem_limit_bytes=_CFG["vmem_limit"],
        ),
    )(*args)
    if Mp != M or Np != N:
        out = out[:M, :N]
    return out


# ------------------------------ attention kernel ------------------------------

def _attn_kernel(q_ref, k_ref, v_ref, o_ref, *, scale):
    # Blocks: q (1,1,tq,dh), k/v (1,1,S,dh) -> contiguous, lane-aligned head-major
    # tiles.  One (batch, head, q-tile) per grid step: no per-head lane slicing,
    # no concat; the head output goes straight to its own output block.
    q = q_ref[0, 0] * scale            # scale folded into q: tq*dh muls, not tq*S
    k = k_ref[0, 0]                    # (S, dh) bf16
    v = v_ref[0, 0]
    s = jax.lax.dot_general(q, k, (((1,), (1,)), ((), ())),
                            preferred_element_type=jnp.float32)       # (tq, S)
    s = s - jnp.max(s, axis=-1, keepdims=True)
    p = jnp.exp(s)
    p = p / jnp.sum(p, axis=-1, keepdims=True)   # exact division (softmax parity)
    o_ref[0, 0] = jnp.dot(p.astype(jnp.bfloat16), v,
                          preferred_element_type=jnp.float32).astype(o_ref.dtype)


def multihead_attention(qkv2d, B, S, n_heads, dim):
    """qkv2d: (B*S, 3*dim) bf16 packed [Q|K|V] -> (B*S, dim) bf16 attention out."""
    dh = dim // n_heads
    # Head-major layout (one cheap XLA transpose of bf16 activations) so every
    # grid step gets (S, dh) blocks with full-dim last axes (block-rule safe).
    qkv = qkv2d.reshape(B, S, 3, n_heads, dh).transpose(2, 0, 3, 1, 4)
    q, k, v = qkv[0], qkv[1], qkv[2]                       # each (B, H, S, dh)
    tq = _choose_tq(S)
    # TODO(synk): for very long S, switch to flash-style KV tiling (online softmax)
    # so the (tq, S) score tile + full-KV blocks stay within v7x's 64 MiB VMEM.
    kern = functools.partial(_attn_kernel, scale=1.0 / math.sqrt(dh))
    out = pl.pallas_call(
        kern,
        grid=(B, n_heads, S // tq),
        in_specs=[pl.BlockSpec((1, 1, tq, dh), lambda b, h, t: (b, h, t, 0)),
                  pl.BlockSpec((1, 1, S, dh), lambda b, h, t: (b, h, 0, 0)),
                  pl.BlockSpec((1, 1, S, dh), lambda b, h, t: (b, h, 0, 0))],
        out_specs=pl.BlockSpec((1, 1, tq, dh), lambda b, h, t: (b, h, t, 0)),
        out_shape=jax.ShapeDtypeStruct((B, n_heads, S, dh), jnp.bfloat16),
        compiler_params=pltpu.CompilerParams(
            dimension_semantics=("parallel", "parallel", "parallel"),
            vmem_limit_bytes=_CFG["vmem_limit"],
        ),
    )(q, k, v)
    return out.transpose(0, 2, 1, 3).reshape(B * S, dim)    # (B*S, dim) bf16


# --------------------------- model glue (plain JAX) ---------------------------

def sinusoidal_pe(seq_len, dim):
    # TODO(synk): PositionalEncoding not defined in the reference; sinusoidal assumed.
    pos = jnp.arange(seq_len, dtype=jnp.float32)[:, None]
    div = jnp.exp(jnp.arange(0, dim, 2, dtype=jnp.float32) * (-math.log(10000.0) / dim))
    pe = jnp.zeros((seq_len, dim), dtype=jnp.float32)
    pe = pe.at[:, 0::2].set(jnp.sin(pos * div))
    pe = pe.at[:, 1::2].set(jnp.cos(pos * div))
    return pe


def transformer_block(x2d, p, B, S, n_heads):
    D = x2d.shape[1]
    # attention branch: LN1 fused into the QKV matmul; qkv emitted bf16 for the
    # bf16 attention kernel; residual add fused into the proj matmul epilogue.
    qkv = fused_linear(x2d, p["attn_w"], p["attn_b"], ln=(p["ln1_g"], p["ln1_b"]),
                       out_dtype=jnp.bfloat16)
    attn = multihead_attention(qkv, B, S, n_heads, D)
    x2d = fused_linear(attn, p["proj_w"], p["proj_b"], residual=x2d)
    # MLP branch: LN2 + GELU fused into fc1 (bf16 out feeds fc2), residual in fc2.
    h = fused_linear(x2d, p["fc1_w"], p["fc1_b"], ln=(p["ln2_g"], p["ln2_b"]),
                     activation="gelu", out_dtype=jnp.bfloat16)
    x2d = fused_linear(h, p["fc2_w"], p["fc2_b"], residual=x2d)
    return x2d


def bias_syntax_bert_forward(params, token_idx, node_idx, cfg):
    B, S = token_idx.shape
    D = cfg["dim"]
    # Embedding gathers + positional encoding in plain JAX (data-dependent gather).
    tok = params["token_emb"][token_idx]                 # (B, S, D)
    clause = params["clause_emb"][node_idx].sum(-2)      # (B, S, N, D) -> (B, S, D)
    pos = sinusoidal_pe(S, D)[None]                      # (1, S, D)
    X = tok + clause + pos
    # embedding dropout: identity in eval mode
    x2d = X.reshape(B * S, D)
    for p in params["blocks"]:
        x2d = transformer_block(x2d, p, B, S, cfg["n_heads"])
    # decoder: nn.Linear(dim, vocab, bias=False); vocab lane-padded inside
    # fused_linear and sliced back (no masked narrow stores, no tile blow-up).
    logits = fused_linear(x2d, params["dec_w"])
    return logits.reshape(B, S, cfg["vocab_size"])


# ----------------------------- parameter init -----------------------------

def init_params(key, cfg):
    D = cfg["dim"]
    V = cfg["vocab_size"]
    NT = cfg["num_node_types"]
    H = 4 * D  # TODO(synk): MLP_small hidden width assumed 4*dim

    def nrm(k, shape, std=0.02, dtype=jnp.float32):
        return (std * jax.random.normal(k, shape, dtype=jnp.float32)).astype(dtype)

    keys = iter(jax.random.split(key, 4 + 4 * cfg["n_layer"]))
    params = {
        "token_emb": nrm(next(keys), (V, D)),
        "clause_emb": nrm(next(keys), (NT, D)),
        "dec_w": nrm(next(keys), (D, V), dtype=jnp.bfloat16),
        "blocks": [],
    }
    proj_std = 0.02 / math.sqrt(2 * 6)  # matches hardcoded 2*6 in the reference
    for _ in range(cfg["n_layer"]):
        # weights pre-cast to bf16, biases pre-shaped to (1, N), LN params to (1, D)
        # once here (no per-call cast/reshape traffic).
        p = {
            "attn_w": nrm(next(keys), (D, 3 * D), dtype=jnp.bfloat16),
            "attn_b": jnp.zeros((1, 3 * D), jnp.float32),
            "proj_w": nrm(next(keys), (D, D), std=proj_std, dtype=jnp.bfloat16),
            "proj_b": jnp.zeros((1, D), jnp.float32),
            "fc1_w": nrm(next(keys), (D, H), dtype=jnp.bfloat16),
            "fc1_b": jnp.zeros((1, H), jnp.float32),
            "fc2_w": nrm(next(keys), (H, D), dtype=jnp.bfloat16),
            "fc2_b": jnp.zeros((1, D), jnp.float32),
            "ln1_g": jnp.ones((1, D), jnp.float32),
            "ln1_b": jnp.zeros((1, D), jnp.float32),
            "ln2_g": jnp.ones((1, D), jnp.float32),
            "ln2_b": jnp.zeros((1, D), jnp.float32),
        }
        params["blocks"].append(p)
    return params


# ----------------------------------- main -----------------------------------

if __name__ == "__main__":
    cfg = dict(
        vocab_size=32,
        block_size=16,
        dim=32,
        n_heads=4,
        n_layer=2,
        num_node_types=8,
    )
    B, S, N_NODES = 2, 8, 3

    key = jax.random.PRNGKey(0)
    k_param, k_tok, k_node = jax.random.split(key, 3)

    params = init_params(k_param, cfg)
    token_idx = jax.random.randint(k_tok, (B, S), 0, cfg["vocab_size"], dtype=jnp.int32)
    node_idx = jax.random.randint(k_node, (B, S, N_NODES), 0, cfg["num_node_types"],
                                  dtype=jnp.int32)

    fwd = jax.jit(lambda p, t, n: bias_syntax_bert_forward(p, t, n, cfg))
    logits = jax.block_until_ready(fwd(params, token_idx, node_idx))
    assert logits.shape == (B, S, cfg["vocab_size"])
    assert bool(jnp.all(jnp.isfinite(logits)))
    print("KERNEL_OK")
</pallas_src>

<mosaic_0001>
module attributes {stable_mosaic.version = 11 : i64} {
  func.func @_fused_linear_kernel(%arg0: i32, %arg1: i32, %arg2: i32, %arg3: memref<16x32xf32, #tpu.memory_space<vmem>>, %arg4: memref<32x128xbf16, #tpu.memory_space<vmem>>, %arg5: memref<1x32xf32, #tpu.memory_space<vmem>>, %arg6: memref<1x32xf32, #tpu.memory_space<vmem>>, %arg7: memref<1x128xf32, #tpu.memory_space<vmem>>, %arg8: memref<16x128xbf16, #tpu.memory_space<vmem>>, %arg9: memref<16x128xf32, #tpu.memory_space<vmem>>, %arg10: memref<16x32xbf16, #tpu.memory_space<vmem>>) attributes {dimension_semantics = [#tpu.dimension_semantics<parallel>, #tpu.dimension_semantics<arbitrary>, #tpu.dimension_semantics<arbitrary>], iteration_bounds = array<i64: 1, 1, 1>, scalar_prefetch = 0 : i64, scratch_operands = 2 : i64, tpu.core_type = #tpu.core_type<tc>, window_params = [{transform_indices = @transform_0, window_bounds = array<i64: 16, 32>}, {transform_indices = @transform_1, window_bounds = array<i64: 32, 128>}, {transform_indices = @transform_2, window_bounds = array<i64: 1, 32>}, {transform_indices = @transform_3, window_bounds = array<i64: 1, 32>}, {transform_indices = @transform_4, window_bounds = array<i64: 1, 128>}, {transform_indices = @transform_5, window_bounds = array<i64: 16, 128>}]} {
    %c0_i32 = arith.constant 0 : i32
    %0 = arith.cmpi eq, %arg2, %c0_i32 : i32
    %1 = arith.extui %0 : i1 to i32
    %c0_i32_0 = arith.constant 0 : i32
    %2 = arith.cmpi ne, %1, %c0_i32_0 : i32
    scf.if %2 {
      %cst_12 = arith.constant 0.000000e+00 : f32
      %15 = vector.broadcast %cst_12 : f32 to vector<16x128xf32>
      %c0_13 = arith.constant 0 : index
      %c0_14 = arith.constant 0 : index
      %16 = vector.load %arg9[%c0_13, %c0_14] : memref<16x128xf32, #tpu.memory_space<vmem>>, vector<16x128xf32>
      tpu.vector_store %arg9[%c0_13, %c0_14], %15 {strides = array<i32>} : memref<16x128xf32, #tpu.memory_space<vmem>>, vector<16x128xf32>,
    } else {
    }
    %c0_i32_1 = arith.constant 0 : i32
    %3 = arith.cmpi eq, %arg1, %c0_i32_1 : i32
    %4 = arith.extui %3 : i1 to i32
    %c0_i32_2 = arith.constant 0 : i32
    %5 = arith.cmpi ne, %4, %c0_i32_2 : i32
    scf.if %5 {
      %c0_12 = arith.constant 0 : index
      %c0_13 = arith.constant 0 : index
      %15 = vector.load %arg3[%c0_12, %c0_13] : memref<16x32xf32, #tpu.memory_space<vmem>>, vector<16x32xf32>
      %cst_14 = arith.constant dense<0.000000e+00> : vector<16xf32>
      %16 = vector.multi_reduction <add>, %15, %cst_14 [1] : vector<16x32xf32> to vector<16xf32>
      %17 = vector.shape_cast %16 : vector<16xf32> to vector<16x1xf32>
      %cst_15 = arith.constant 3.200000e+01 : f32
      %18 = vector.broadcast %cst_15 : f32 to vector<16x1xf32>
      %19 = arith.divf %17, %18 : vector<16x1xf32>
      %20 = vector.broadcast %19 : vector<16x1xf32> to vector<16x32xf32>
      %21 = arith.subf %15, %20 : vector<16x32xf32>
      %22 = arith.mulf %21, %21 : vector<16x32xf32>
      %cst_16 = arith.constant dense<0.000000e+00> : vector<16xf32>
      %23 = vector.multi_reduction <add>, %22, %cst_16 [1] : vector<16x32xf32> to vector<16xf32>
      %24 = vector.shape_cast %23 : vector<16xf32> to vector<16x1xf32>
      %cst_17 = arith.constant 3.200000e+01 : f32
      %25 = vector.broadcast %cst_17 : f32 to vector<16x1xf32>
      %26 = arith.divf %24, %25 : vector<16x1xf32>
      %27 = vector.broadcast %19 : vector<16x1xf32> to vector<16x32xf32>
      %28 = arith.subf %15, %27 : vector<16x32xf32>
      %cst_18 = arith.constant 9.99999974E-6 : f32
      %29 = vector.broadcast %cst_18 : f32 to vector<16x1xf32>
      %30 = arith.addf %26, %29 : vector<16x1xf32>
      %31 = math.rsqrt %30 : vector<16x1xf32>
      %32 = vector.broadcast %31 : vector<16x1xf32> to vector<16x32xf32>
      %33 = arith.mulf %28, %32 : vector<16x32xf32>
      %c0_19 = arith.constant 0 : index
      %c0_20 = arith.constant 0 : index
      %34 = vector.load %arg5[%c0_19, %c0_20] : memref<1x32xf32, #tpu.memory_space<vmem>>, vector<1x32xf32>
      %35 = vector.broadcast %34 : vector<1x32xf32> to vector<16x32xf32>
      %36 = arith.mulf %33, %35 : vector<16x32xf32>
      %c0_21 = arith.constant 0 : index
      %c0_22 = arith.constant 0 : index
      %37 = vector.load %arg6[%c0_21, %c0_22] : memref<1x32xf32, #tpu.memory_space<vmem>>, vector<1x32xf32>
      %38 = vector.broadcast %37 : vector<1x32xf32> to vector<16x32xf32>
      %39 = arith.addf %36, %38 : vector<16x32xf32>
      %40 = arith.truncf %39 : vector<16x32xf32> to vector<16x32xbf16>
      %c0_23 = arith.constant 0 : index
      %c0_24 = arith.constant 0 : index
      %41 = vector.load %arg10[%c0_23, %c0_24] : memref<16x32xbf16, #tpu.memory_space<vmem>>, vector<16x32xbf16>
      tpu.vector_store %arg10[%c0_23, %c0_24], %40 {strides = array<i32>} : memref<16x32xbf16, #tpu.memory_space<vmem>>, vector<16x32xbf16>,
    } else {
    }
    %c0 = arith.constant 0 : index
    %c0_3 = arith.constant 0 : index
    %6 = vector.load %arg10[%c0, %c0_3] : memref<16x32xbf16, #tpu.memory_space<vmem>>, vector<16x32xbf16>
    %c0_4 = arith.constant 0 : index
    %c0_5 = arith.constant 0 : index
    %7 = vector.load %arg9[%c0_4, %c0_5] : memref<16x128xf32, #tpu.memory_space<vmem>>, vector<16x128xf32>
    %c0_6 = arith.constant 0 : index
    %c0_7 = arith.constant 0 : index
    %8 = vector.load %arg4[%c0_6, %c0_7] : memref<32x128xbf16, #tpu.memory_space<vmem>>, vector<32x128xbf16>
    %cst = arith.constant dense<0.000000e+00> : vector<16x128xf32>
    %9 = tpu.matmul %6, %8, %cst {dimension_numbers = #tpu.dot_dimension_numbers<[1], [0], [0], [1], [0, 0, 1, 1], [], []>} : vector<16x32xbf16>, vector<32x128xbf16>, vector<16x128xf32> -> vector<16x128xf32>
    %10 = arith.addf %7, %9 : vector<16x128xf32>
    %c0_8 = arith.constant 0 : index
    %c0_9 = arith.constant 0 : index
    %11 = vector.load %arg9[%c0_8, %c0_9] : memref<16x128xf32, #tpu.memory_space<vmem>>, vector<16x128xf32>
    tpu.vector_store %arg9[%c0_8, %c0_9], %10 {strides = array<i32>} : memref<16x128xf32, #tpu.memory_space<vmem>>, vector<16x128xf32>,
    %c0_i32_10 = arith.constant 0 : i32
    %12 = arith.cmpi eq, %arg2, %c0_i32_10 : i32
    %13 = arith.extui %12 : i1 to i32
    %c0_i32_11 = arith.constant 0 : i32
    %14 = arith.cmpi ne, %13, %c0_i32_11 : i32
    scf.if %14 {
      %c0_12 = arith.constant 0 : index
      %c0_13 = arith.constant 0 : index
      %15 = vector.load %arg9[%c0_12, %c0_13] : memref<16x128xf32, #tpu.memory_space<vmem>>, vector<16x128xf32>
      %c0_14 = arith.constant 0 : index
      %c0_15 = arith.constant 0 : index
      %16 = vector.load %arg7[%c0_14, %c0_15] : memref<1x128xf32, #tpu.memory_space<vmem>>, vector<1x128xf32>
      %17 = vector.broadcast %16 : vector<1x128xf32> to vector<16x128xf32>
      %18 = arith.addf %15, %17 : vector<16x128xf32>
      %19 = arith.truncf %18 : vector<16x128xf32> to vector<16x128xbf16>
      %c0_16 = arith.constant 0 : index
      %c0_17 = arith.constant 0 : index
      %20 = vector.load %arg8[%c0_16, %c0_17] : memref<16x128xbf16, #tpu.memory_space<vmem>>, vector<16x128xbf16>
      tpu.vector_store %arg8[%c0_16, %c0_17], %19 {strides = array<i32>} : memref<16x128xbf16, #tpu.memory_space<vmem>>, vector<16x128xbf16>,
    } else {
    }
    return
  }
  func.func @transform_0(%arg0: i32, %arg1: i32, %arg2: i32) -> (i32, i32) {
    %c0_i32 = arith.constant 0 : i32
    return %arg0, %arg2 : i32, i32
  }
  func.func @transform_1(%arg0: i32, %arg1: i32, %arg2: i32) -> (i32, i32) {
    %c0_i32 = arith.constant 0 : i32
    return %arg2, %arg1 : i32, i32
  }
  func.func @transform_2(%arg0: i32, %arg1: i32, %arg2: i32) -> (i32, i32) {
    %c0_i32 = arith.constant 0 : i32
    %c0_i32_0 = arith.constant 0 : i32
    return %c0_i32, %arg2 : i32, i32
  }
  func.func @transform_3(%arg0: i32, %arg1: i32, %arg2: i32) -> (i32, i32) {
    %c0_i32 = arith.constant 0 : i32
    %c0_i32_0 = arith.constant 0 : i32
    return %c0_i32, %arg2 : i32, i32
  }
  func.func @transform_4(%arg0: i32, %arg1: i32, %arg2: i32) -> (i32, i32) {
    %c0_i32 = arith.constant 0 : i32
    %c0_i32_0 = arith.constant 0 : i32
    return %c0_i32, %arg1 : i32, i32
  }
  func.func @transform_5(%arg0: i32, %arg1: i32, %arg2: i32) -> (i32, i32) {
    %c0_i32 = arith.constant 0 : i32
    return %arg0, %arg1 : i32, i32
  }
}

module attributes {stable_mosaic.version = 11 : i64} {
  func.func @_attn_kernel(%arg0: i32, %arg1: i32, %arg2: i32, %arg3: memref<1x1x8x8xbf16, #tpu.memory_space<vmem>>, %arg4: memref<1x1x8x8xbf16, #tpu.memory_space<vmem>>, %arg5: memref<1x1x8x8xbf16, #tpu.memory_space<vmem>>, %arg6: memref<1x1x8x8xbf16, #tpu.memory_space<vmem>>) attributes {dimension_semantics = [#tpu.dimension_semantics<parallel>, #tpu.dimension_semantics<parallel>, #tpu.dimension_semantics<parallel>], iteration_bounds = array<i64: 2, 4, 1>, scalar_prefetch = 0 : i64, scratch_operands = 0 : i64, tpu.core_type = #tpu.core_type<tc>, window_params = [{transform_indices = @transform_0, window_bounds = array<i64: 1, 1, 8, 8>}, {transform_indices = @transform_1, window_bounds = array<i64: 1, 1, 8, 8>}, {transform_indices = @transform_2, window_bounds = array<i64: 1, 1, 8, 8>}, {transform_indices = @transform_3, window_bounds = array<i64: 1, 1, 8, 8>}]} {
    %c0 = arith.constant 0 : index
    %c0_0 = arith.constant 0 : index
    %c0_1 = arith.constant 0 : index
    %c0_2 = arith.constant 0 : index
    %0 = vector.load %arg3[%c0, %c0_0, %c0_1, %c0_2] : memref<1x1x8x8xbf16, #tpu.memory_space<vmem>>, vector<1x1x8x8xbf16>
    %1 = vector.shape_cast %0 : vector<1x1x8x8xbf16> to vector<8x8xbf16>
    %cst = arith.constant 3.535160e-01 : bf16
    %2 = vector.broadcast %cst : bf16 to vector<8x8xbf16>
    %3 = arith.mulf %1, %2 : vector<8x8xbf16>
    %c0_3 = arith.constant 0 : index
    %c0_4 = arith.constant 0 : index
    %c0_5 = arith.constant 0 : index
    %c0_6 = arith.constant 0 : index
    %4 = vector.load %arg4[%c0_3, %c0_4, %c0_5, %c0_6] : memref<1x1x8x8xbf16, #tpu.memory_space<vmem>>, vector<1x1x8x8xbf16>
    %5 = vector.shape_cast %4 : vector<1x1x8x8xbf16> to vector<8x8xbf16>
    %c0_7 = arith.constant 0 : index
    %c0_8 = arith.constant 0 : index
    %c0_9 = arith.constant 0 : index
    %c0_10 = arith.constant 0 : index
    %6 = vector.load %arg5[%c0_7, %c0_8, %c0_9, %c0_10] : memref<1x1x8x8xbf16, #tpu.memory_space<vmem>>, vector<1x1x8x8xbf16>
    %7 = vector.shape_cast %6 : vector<1x1x8x8xbf16> to vector<8x8xbf16>
    %cst_11 = arith.constant dense<0.000000e+00> : vector<8x8xf32>
    %8 = tpu.matmul %3, %5, %cst_11 {dimension_numbers = #tpu.dot_dimension_numbers<[1], [1], [0], [0], [0, 0, 1, 0], [], []>} : vector<8x8xbf16>, vector<8x8xbf16>, vector<8x8xf32> -> vector<8x8xf32>
    %cst_12 = arith.constant dense<0xFF800000> : vector<8xf32>
    %9 = vector.multi_reduction <maximumf>, %8, %cst_12 [1] : vector<8x8xf32> to vector<8xf32>
    %10 = vector.shape_cast %9 : vector<8xf32> to vector<8x1xf32>
    %11 = vector.broadcast %10 : vector<8x1xf32> to vector<8x8xf32>
    %12 = arith.subf %8, %11 : vector<8x8xf32>
    %13 = math.exp %12 : vector<8x8xf32>
    %cst_13 = arith.constant dense<0.000000e+00> : vector<8xf32>
    %14 = vector.multi_reduction <add>, %13, %cst_13 [1] : vector<8x8xf32> to vector<8xf32>
    %15 = vector.shape_cast %14 : vector<8xf32> to vector<8x1xf32>
    %16 = vector.broadcast %15 : vector<8x1xf32> to vector<8x8xf32>
    %17 = arith.divf %13, %16 : vector<8x8xf32>
    %18 = arith.truncf %17 : vector<8x8xf32> to vector<8x8xbf16>
    %cst_14 = arith.constant dense<0.000000e+00> : vector<8x8xf32>
    %19 = tpu.matmul %18, %7, %cst_14 {dimension_numbers = #tpu.dot_dimension_numbers<[1], [0], [0], [1], [0, 0, 1, 1], [], []>} : vector<8x8xbf16>, vector<8x8xbf16>, vector<8x8xf32> -> vector<8x8xf32>
    %20 = arith.truncf %19 : vector<8x8xf32> to vector<8x8xbf16>
    %c0_15 = arith.constant 0 : index
    %c0_16 = arith.constant 0 : index
    %c0_17 = arith.constant 0 : index
    %c0_18 = arith.constant 0 : index
    %21 = vector.load %arg6[%c0_15, %c0_16, %c0_17, %c0_18] : memref<1x1x8x8xbf16, #tpu.memory_space<vmem>>, vector<1x1x8x8xbf16>
    %22 = vector.shape_cast %21 : vector<1x1x8x8xbf16> to vector<8x8xbf16>
    %23 = vector.shape_cast %20 : vector<8x8xbf16> to vector<1x1x8x8xbf16>
    tpu.vector_store %arg6[%c0_15, %c0_16, %c0_17, %c0_18], %23 {strides = array<i32>} : memref<1x1x8x8xbf16, #tpu.memory_space<vmem>>, vector<1x1x8x8xbf16>,
    return
  }
  func.func @transform_0(%arg0: i32, %arg1: i32, %arg2: i32) -> (i32, i32, i32, i32) {
    %c0_i32 = arith.constant 0 : i32
    %c0_i32_0 = arith.constant 0 : i32
    return %arg0, %arg1, %arg2, %c0_i32 : i32, i32, i32, i32
  }
  func.func @transform_1(%arg0: i32, %arg1: i32, %arg2: i32) -> (i32, i32, i32, i32) {
    %c0_i32 = arith.constant 0 : i32
    %c0_i32_0 = arith.constant 0 : i32
    %c0_i32_1 = arith.constant 0 : i32
    return %arg0, %arg1, %c0_i32, %c0_i32_0 : i32, i32, i32, i32
  }
  func.func @transform_2(%arg0: i32, %arg1: i32, %arg2: i32) -> (i32, i32, i32, i32) {
    %c0_i32 = arith.constant 0 : i32
    %c0_i32_0 = arith.constant 0 : i32
    %c0_i32_1 = arith.constant 0 : i32
    return %arg0, %arg1, %c0_i32, %c0_i32_0 : i32, i32, i32, i32
  }
  func.func @transform_3(%arg0: i32, %arg1: i32, %arg2: i32) -> (i32, i32, i32, i32) {
    %c0_i32 = arith.constant 0 : i32
    %c0_i32_0 = arith.constant 0 : i32
    return %arg0, %arg1, %arg2, %c0_i32 : i32, i32, i32, i32
  }
}

module attributes {stable_mosaic.version = 11 : i64} {
  func.func @_fused_linear_kernel(%arg0: i32, %arg1: i32, %arg2: i32, %arg3: memref<16x32xbf16, #tpu.memory_space<vmem>>, %arg4: memref<32x128xbf16, #tpu.memory_space<vmem>>, %arg5: memref<1x128xf32, #tpu.memory_space<vmem>>, %arg6: memref<16x128xf32, #tpu.memory_space<vmem>>, %arg7: memref<16x128xf32, #tpu.memory_space<vmem>>, %arg8: memref<16x128xf32, #tpu.memory_space<vmem>>) attributes {dimension_semantics = [#tpu.dimension_semantics<parallel>, #tpu.dimension_semantics<parallel>, #tpu.dimension_semantics<arbitrary>], iteration_bounds = array<i64: 1, 1, 1>, scalar_prefetch = 0 : i64, scratch_operands = 1 : i64, tpu.core_type = #tpu.core_type<tc>, window_params = [{transform_indices = @transform_0, window_bounds = array<i64: 16, 32>}, {transform_indices = @transform_1, window_bounds = array<i64: 32, 128>}, {transform_indices = @transform_2, window_bounds = array<i64: 1, 128>}, {transform_indices = @transform_3, window_bounds = array<i64: 16, 128>}, {transform_indices = @transform_4, window_bounds = array<i64: 16, 128>}]} {
    %c0_i32 = arith.constant 0 : i32
    %0 = arith.cmpi eq, %arg2, %c0_i32 : i32
    %1 = arith.extui %0 : i1 to i32
    %c0_i32_0 = arith.constant 0 : i32
    %2 = arith.cmpi ne, %1, %c0_i32_0 : i32
    scf.if %2 {
      %cst_10 = arith.constant 0.000000e+00 : f32
      %12 = vector.broadcast %cst_10 : f32 to vector<16x128xf32>
      %c0_11 = arith.constant 0 : index
      %c0_12 = arith.constant 0 : index
      %13 = vector.load %arg8[%c0_11, %c0_12] : memref<16x128xf32, #tpu.memory_space<vmem>>, vector<16x128xf32>
      tpu.vector_store %arg8[%c0_11, %c0_12], %12 {strides = array<i32>} : memref<16x128xf32, #tpu.memory_space<vmem>>, vector<16x128xf32>,
    } else {
    }
    %c0 = arith.constant 0 : index
    %c0_1 = arith.constant 0 : index
    %3 = vector.load %arg3[%c0, %c0_1] : memref<16x32xbf16, #tpu.memory_space<vmem>>, vector<16x32xbf16>
    %c0_2 = arith.constant 0 : index
    %c0_3 = arith.constant 0 : index
    %4 = vector.load %arg8[%c0_2, %c0_3] : memref<16x128xf32, #tpu.memory_space<vmem>>, vector<16x128xf32>
    %c0_4 = arith.constant 0 : index
    %c0_5 = arith.constant 0 : index
    %5 = vector.load %arg4[%c0_4, %c0_5] : memref<32x128xbf16, #tpu.memory_space<vmem>>, vector<32x128xbf16>
    %cst = arith.constant dense<0.000000e+00> : vector<16x128xf32>
    %6 = tpu.matmul %3, %5, %cst {dimension_numbers = #tpu.dot_dimension_numbers<[1], [0], [0], [1], [0, 0, 1, 1], [], []>} : vector<16x32xbf16>, vector<32x128xbf16>, vector<16x128xf32> -> vector<16x128xf32>
    %7 = arith.addf %4, %6 : vector<16x128xf32>
    %c0_6 = arith.constant 0 : index
    %c0_7 = arith.constant 0 : index
    %8 = vector.load %arg8[%c0_6, %c0_7] : memref<16x128xf32, #tpu.memory_space<vmem>>, vector<16x128xf32>
    tpu.vector_store %arg8[%c0_6, %c0_7], %7 {strides = array<i32>} : memref<16x128xf32, #tpu.memory_space<vmem>>, vector<16x128xf32>,
    %c0_i32_8 = arith.constant 0 : i32
    %9 = arith.cmpi eq, %arg2, %c0_i32_8 : i32
    %10 = arith.extui %9 : i1 to i32
    %c0_i32_9 = arith.constant 0 : i32
    %11 = arith.cmpi ne, %10, %c0_i32_9 : i32
    scf.if %11 {
      %c0_10 = arith.constant 0 : index
      %c0_11 = arith.constant 0 : index
      %12 = vector.load %arg8[%c0_10, %c0_11] : memref<16x128xf32, #tpu.memory_space<vmem>>, vector<16x128xf32>
      %c0_12 = arith.constant 0 : index
      %c0_13 = arith.constant 0 : index
      %13 = vector.load %arg5[%c0_12, %c0_13] : memref<1x128xf32, #tpu.memory_space<vmem>>, vector<1x128xf32>
      %14 = vector.broadcast %13 : vector<1x128xf32> to vector<16x128xf32>
      %15 = arith.addf %12, %14 : vector<16x128xf32>
      %c0_14 = arith.constant 0 : index
      %c0_15 = arith.constant 0 : index
      %16 = vector.load %arg6[%c0_14, %c0_15] : memref<16x128xf32, #tpu.memory_space<vmem>>, vector<16x128xf32>
      %17 = arith.addf %15, %16 : vector<16x128xf32>
      %c0_16 = arith.constant 0 : index
      %c0_17 = arith.constant 0 : index
      %18 = vector.load %arg7[%c0_16, %c0_17] : memref<16x128xf32, #tpu.memory_space<vmem>>, vector<16x128xf32>
      tpu.vector_store %arg7[%c0_16, %c0_17], %17 {strides = array<i32>} : memref<16x128xf32, #tpu.memory_space<vmem>>, vector<16x128xf32>,
    } else {
    }
    return
  }
  func.func @transform_0(%arg0: i32, %arg1: i32, %arg2: i32) -> (i32, i32) {
    %c0_i32 = arith.constant 0 : i32
    return %arg0, %arg2 : i32, i32
  }
  func.func @transform_1(%arg0: i32, %arg1: i32, %arg2: i32) -> (i32, i32) {
    %c0_i32 = arith.constant 0 : i32
    return %arg2, %arg1 : i32, i32
  }
  func.func @transform_2(%arg0: i32, %arg1: i32, %arg2: i32) -> (i32, i32) {
    %c0_i32 = arith.constant 0 : i32
    %c0_i32_0 = arith.constant 0 : i32
    return %c0_i32, %arg1 : i32, i32
  }
  func.func @transform_3(%arg0: i32, %arg1: i32, %arg2: i32) -> (i32, i32) {
    %c0_i32 = arith.constant 0 : i32
    return %arg0, %arg1 : i32, i32
  }
  func.func @transform_4(%arg0: i32, %arg1: i32, %arg2: i32) -> (i32, i32) {
    %c0_i32 = arith.constant 0 : i32
    return %arg0, %arg1 : i32, i32
  }
}

module attributes {stable_mosaic.version = 11 : i64} {
  func.func @_fused_linear_kernel(%arg0: i32, %arg1: i32, %arg2: i32, %arg3: memref<16x32xf32, #tpu.memory_space<vmem>>, %arg4: memref<32x128xbf16, #tpu.memory_space<vmem>>, %arg5: memref<1x32xf32, #tpu.memory_space<vmem>>, %arg6: memref<1x32xf32, #tpu.memory_space<vmem>>, %arg7: memref<1x128xf32, #tpu.memory_space<vmem>>, %arg8: memref<16x128xbf16, #tpu.memory_space<vmem>>, %arg9: memref<16x128xf32, #tpu.memory_space<vmem>>, %arg10: memref<16x32xbf16, #tpu.memory_space<vmem>>) attributes {dimension_semantics = [#tpu.dimension_semantics<parallel>, #tpu.dimension_semantics<arbitrary>, #tpu.dimension_semantics<arbitrary>], iteration_bounds = array<i64: 1, 1, 1>, scalar_prefetch = 0 : i64, scratch_operands = 2 : i64, tpu.core_type = #tpu.core_type<tc>, window_params = [{transform_indices = @transform_0, window_bounds = array<i64: 16, 32>}, {transform_indices = @transform_1, window_bounds = array<i64: 32, 128>}, {transform_indices = @transform_2, window_bounds = array<i64: 1, 32>}, {transform_indices = @transform_3, window_bounds = array<i64: 1, 32>}, {transform_indices = @transform_4, window_bounds = array<i64: 1, 128>}, {transform_indices = @transform_5, window_bounds = array<i64: 16, 128>}]} {
    %c0_i32 = arith.constant 0 : i32
    %0 = arith.cmpi eq, %arg2, %c0_i32 : i32
    %1 = arith.extui %0 : i1 to i32
    %c0_i32_0 = arith.constant 0 : i32
    %2 = arith.cmpi ne, %1, %c0_i32_0 : i32
    scf.if %2 {
      %cst_12 = arith.constant 0.000000e+00 : f32
      %15 = vector.broadcast %cst_12 : f32 to vector<16x128xf32>
      %c0_13 = arith.constant 0 : index
      %c0_14 = arith.constant 0 : index
      %16 = vector.load %arg9[%c0_13, %c0_14] : memref<16x128xf32, #tpu.memory_space<vmem>>, vector<16x128xf32>
      tpu.vector_store %arg9[%c0_13, %c0_14], %15 {strides = array<i32>} : memref<16x128xf32, #tpu.memory_space<vmem>>, vector<16x128xf32>,
    } else {
    }
    %c0_i32_1 = arith.constant 0 : i32
    %3 = arith.cmpi eq, %arg1, %c0_i32_1 : i32
    %4 = arith.extui %3 : i1 to i32
    %c0_i32_2 = arith.constant 0 : i32
    %5 = arith.cmpi ne, %4, %c0_i32_2 : i32
    scf.if %5 {
      %c0_12 = arith.constant 0 : index
      %c0_13 = arith.constant 0 : index
      %15 = vector.load %arg3[%c0_12, %c0_13] : memref<16x32xf32, #tpu.memory_space<vmem>>, vector<16x32xf32>
      %cst_14 = arith.constant dense<0.000000e+00> : vector<16xf32>
      %16 = vector.multi_reduction <add>, %15, %cst_14 [1] : vector<16x32xf32> to vector<16xf32>
      %17 = vector.shape_cast %16 : vector<16xf32> to vector<16x1xf32>
      %cst_15 = arith.constant 3.200000e+01 : f32
      %18 = vector.broadcast %cst_15 : f32 to vector<16x1xf32>
      %19 = arith.divf %17, %18 : vector<16x1xf32>
      %20 = vector.broadcast %19 : vector<16x1xf32> to vector<16x32xf32>
      %21 = arith.subf %15, %20 : vector<16x32xf32>
      %22 = arith.mulf %21, %21 : vector<16x32xf32>
      %cst_16 = arith.constant dense<0.000000e+00> : vector<16xf32>
      %23 = vector.multi_reduction <add>, %22, %cst_16 [1] : vector<16x32xf32> to vector<16xf32>
      %24 = vector.shape_cast %23 : vector<16xf32> to vector<16x1xf32>
      %cst_17 = arith.constant 3.200000e+01 : f32
      %25 = vector.broadcast %cst_17 : f32 to vector<16x1xf32>
      %26 = arith.divf %24, %25 : vector<16x1xf32>
      %27 = vector.broadcast %19 : vector<16x1xf32> to vector<16x32xf32>
      %28 = arith.subf %15, %27 : vector<16x32xf32>
      %cst_18 = arith.constant 9.99999974E-6 : f32
      %29 = vector.broadcast %cst_18 : f32 to vector<16x1xf32>
      %30 = arith.addf %26, %29 : vector<16x1xf32>
      %31 = math.rsqrt %30 : vector<16x1xf32>
      %32 = vector.broadcast %31 : vector<16x1xf32> to vector<16x32xf32>
      %33 = arith.mulf %28, %32 : vector<16x32xf32>
      %c0_19 = arith.constant 0 : index
      %c0_20 = arith.constant 0 : index
      %34 = vector.load %arg5[%c0_19, %c0_20] : memref<1x32xf32, #tpu.memory_space<vmem>>, vector<1x32xf32>
      %35 = vector.broadcast %34 : vector<1x32xf32> to vector<16x32xf32>
      %36 = arith.mulf %33, %35 : vector<16x32xf32>
      %c0_21 = arith.constant 0 : index
      %c0_22 = arith.constant 0 : index
      %37 = vector.load %arg6[%c0_21, %c0_22] : memref<1x32xf32, #tpu.memory_space<vmem>>, vector<1x32xf32>
      %38 = vector.broadcast %37 : vector<1x32xf32> to vector<16x32xf32>
      %39 = arith.addf %36, %38 : vector<16x32xf32>
      %40 = arith.truncf %39 : vector<16x32xf32> to vector<16x32xbf16>
      %c0_23 = arith.constant 0 : index
      %c0_24 = arith.constant 0 : index
      %41 = vector.load %arg10[%c0_23, %c0_24] : memref<16x32xbf16, #tpu.memory_space<vmem>>, vector<16x32xbf16>
      tpu.vector_store %arg10[%c0_23, %c0_24], %40 {strides = array<i32>} : memref<16x32xbf16, #tpu.memory_space<vmem>>, vector<16x32xbf16>,
    } else {
    }
    %c0 = arith.constant 0 : index
    %c0_3 = arith.constant 0 : index
    %6 = vector.load %arg10[%c0, %c0_3] : memref<16x32xbf16, #tpu.memory_space<vmem>>, vector<16x32xbf16>
    %c0_4 = arith.constant 0 : index
    %c0_5 = arith.constant 0 : index
    %7 = vector.load %arg9[%c0_4, %c0_5] : memref<16x128xf32, #tpu.memory_space<vmem>>, vector<16x128xf32>
    %c0_6 = arith.constant 0 : index
    %c0_7 = arith.constant 0 : index
    %8 = vector.load %arg4[%c0_6, %c0_7] : memref<32x128xbf16, #tpu.memory_space<vmem>>, vector<32x128xbf16>
    %cst = arith.constant dense<0.000000e+00> : vector<16x128xf32>
    %9 = tpu.matmul %6, %8, %cst {dimension_numbers = #tpu.dot_dimension_numbers<[1], [0], [0], [1], [0, 0, 1, 1], [], []>} : vector<16x32xbf16>, vector<32x128xbf16>, vector<16x128xf32> -> vector<16x128xf32>
    %10 = arith.addf %7, %9 : vector<16x128xf32>
    %c0_8 = arith.constant 0 : index
    %c0_9 = arith.constant 0 : index
    %11 = vector.load %arg9[%c0_8, %c0_9] : memref<16x128xf32, #tpu.memory_space<vmem>>, vector<16x128xf32>
    tpu.vector_store %arg9[%c0_8, %c0_9], %10 {strides = array<i32>} : memref<16x128xf32, #tpu.memory_space<vmem>>, vector<16x128xf32>,
    %c0_i32_10 = arith.constant 0 : i32
    %12 = arith.cmpi eq, %arg2, %c0_i32_10 : i32
    %13 = arith.extui %12 : i1 to i32
    %c0_i32_11 = arith.constant 0 : i32
    %14 = arith.cmpi ne, %13, %c0_i32_11 : i32
    scf.if %14 {
      %c0_12 = arith.constant 0 : index
      %c0_13 = arith.constant 0 : index
      %15 = vector.load %arg9[%c0_12, %c0_13] : memref<16x128xf32, #tpu.memory_space<vmem>>, vector<16x128xf32>
      %c0_14 = arith.constant 0 : index
      %c0_15 = arith.constant 0 : index
      %16 = vector.load %arg7[%c0_14, %c0_15] : memref<1x128xf32, #tpu.memory_space<vmem>>, vector<1x128xf32>
      %17 = vector.broadcast %16 : vector<1x128xf32> to vector<16x128xf32>
      %18 = arith.addf %15, %17 : vector<16x128xf32>
      %19 = arith.mulf %18, %18 : vector<16x128xf32>
      %20 = arith.mulf %18, %19 : vector<16x128xf32>
      %cst_16 = arith.constant 4.471500e-02 : f32
      %21 = vector.broadcast %cst_16 : f32 to vector<16x128xf32>
      %22 = arith.mulf %21, %20 : vector<16x128xf32>
      %23 = arith.addf %18, %22 : vector<16x128xf32>
      %cst_17 = arith.constant 0.797884583 : f32
      %24 = vector.broadcast %cst_17 : f32 to vector<16x128xf32>
      %25 = arith.mulf %24, %23 : vector<16x128xf32>
      %26 = math.tanh %25 : vector<16x128xf32>
      %cst_18 = arith.constant 1.000000e+00 : f32
      %27 = vector.broadcast %cst_18 : f32 to vector<16x128xf32>
      %28 = arith.addf %27, %26 : vector<16x128xf32>
      %cst_19 = arith.constant 5.000000e-01 : f32
      %29 = vector.broadcast %cst_19 : f32 to vector<16x128xf32>
      %30 = arith.mulf %29, %28 : vector<16x128xf32>
      %31 = arith.mulf %18, %30 : vector<16x128xf32>
      %32 = arith.truncf %31 : vector<16x128xf32> to vector<16x128xbf16>
      %c0_20 = arith.constant 0 : index
      %c0_21 = arith.constant 0 : index
      %33 = vector.load %arg8[%c0_20, %c0_21] : memref<16x128xbf16, #tpu.memory_space<vmem>>, vector<16x128xbf16>
      tpu.vector_store %arg8[%c0_20, %c0_21], %32 {strides = array<i32>} : memref<16x128xbf16, #tpu.memory_space<vmem>>, vector<16x128xbf16>,
    } else {
    }
    return
  }
  func.func @transform_0(%arg0: i32, %arg1: i32, %arg2: i32) -> (i32, i32) {
    %c0_i32 = arith.constant 0 : i32
    return %arg0, %arg2 : i32, i32
  }
  func.func @transform_1(%arg0: i32, %arg1: i32, %arg2: i32) -> (i32, i32) {
    %c0_i32 = arith.constant 0 : i32
    return %arg2, %arg1 : i32, i32
  }
  func.func @transform_2(%arg0: i32, %arg1: i32, %arg2: i32) -> (i32, i32) {
    %c0_i32 = arith.constant 0 : i32
    %c0_i32_0 = arith.constant 0 : i32
    return %c0_i32, %arg2 : i32, i32
  }
  func.func @transform_3(%arg0: i32, %arg1: i32, %arg2: i32) -> (i32, i32) {
    %c0_i32 = arith.constant 0 : i32
    %c0_i32_0 = arith.constant 0 : i32
    return %c0_i32, %arg2 : i32, i32
  }
  func.func @transform_4(%arg0: i32, %arg1: i32, %arg2: i32) -> (i32, i32) {
    %c0_i32 = arith.constant 0 : i32
    %c0_i32_0 = arith.constant 0 : i32
    return %c0_i32, %arg1 : i32, i32
  }
  func.func @transform_5(%arg0: i32, %arg1: i32, %arg2: i32) -> (i32, i32) {
    %c0_i32 = arith.constant 0 : i32
    return %arg0, %arg1 : i32, i32
  }
}

module attributes {stable_mosaic.version = 11 : i64} {
  func.func @_fused_linear_kernel(%arg0: i32, %arg1: i32, %arg2: i32, %arg3: memref<16x32xf32, #tpu.memory_space<vmem>>, %arg4: memref<32x128xbf16, #tpu.memory_space<vmem>>, %arg5: memref<16x128xf32, #tpu.memory_space<vmem>>, %arg6: memref<16x128xf32, #tpu.memory_space<vmem>>) attributes {dimension_semantics = [#tpu.dimension_semantics<parallel>, #tpu.dimension_semantics<parallel>, #tpu.dimension_semantics<arbitrary>], iteration_bounds = array<i64: 1, 1, 1>, scalar_prefetch = 0 : i64, scratch_operands = 1 : i64, tpu.core_type = #tpu.core_type<tc>, window_params = [{transform_indices = @transform_0, window_bounds = array<i64: 16, 32>}, {transform_indices = @transform_1, window_bounds = array<i64: 32, 128>}, {transform_indices = @transform_2, window_bounds = array<i64: 16, 128>}]} {
    %c0_i32 = arith.constant 0 : i32
    %0 = arith.cmpi eq, %arg2, %c0_i32 : i32
    %1 = arith.extui %0 : i1 to i32
    %c0_i32_0 = arith.constant 0 : i32
    %2 = arith.cmpi ne, %1, %c0_i32_0 : i32
    scf.if %2 {
      %cst_10 = arith.constant 0.000000e+00 : f32
      %13 = vector.broadcast %cst_10 : f32 to vector<16x128xf32>
      %c0_11 = arith.constant 0 : index
      %c0_12 = arith.constant 0 : index
      %14 = vector.load %arg6[%c0_11, %c0_12] : memref<16x128xf32, #tpu.memory_space<vmem>>, vector<16x128xf32>
      tpu.vector_store %arg6[%c0_11, %c0_12], %13 {strides = array<i32>} : memref<16x128xf32, #tpu.memory_space<vmem>>, vector<16x128xf32>,
    } else {
    }
    %c0 = arith.constant 0 : index
    %c0_1 = arith.constant 0 : index
    %3 = vector.load %arg3[%c0, %c0_1] : memref<16x32xf32, #tpu.memory_space<vmem>>, vector<16x32xf32>
    %4 = arith.truncf %3 : vector<16x32xf32> to vector<16x32xbf16>
    %c0_2 = arith.constant 0 : index
    %c0_3 = arith.constant 0 : index
    %5 = vector.load %arg6[%c0_2, %c0_3] : memref<16x128xf32, #tpu.memory_space<vmem>>, vector<16x128xf32>
    %c0_4 = arith.constant 0 : index
    %c0_5 = arith.constant 0 : index
    %6 = vector.load %arg4[%c0_4, %c0_5] : memref<32x128xbf16, #tpu.memory_space<vmem>>, vector<32x128xbf16>
    %cst = arith.constant dense<0.000000e+00> : vector<16x128xf32>
    %7 = tpu.matmul %4, %6, %cst {dimension_numbers = #tpu.dot_dimension_numbers<[1], [0], [0], [1], [0, 0, 1, 1], [], []>} : vector<16x32xbf16>, vector<32x128xbf16>, vector<16x128xf32> -> vector<16x128xf32>
    %8 = arith.addf %5, %7 : vector<16x128xf32>
    %c0_6 = arith.constant 0 : index
    %c0_7 = arith.constant 0 : index
    %9 = vector.load %arg6[%c0_6, %c0_7] : memref<16x128xf32, #tpu.memory_space<vmem>>, vector<16x128xf32>
    tpu.vector_store %arg6[%c0_6, %c0_7], %8 {strides = array<i32>} : memref<16x128xf32, #tpu.memory_space<vmem>>, vector<16x128xf32>,
    %c0_i32_8 = arith.constant 0 : i32
    %10 = arith.cmpi eq, %arg2, %c0_i32_8 : i32
    %11 = arith.extui %10 : i1 to i32
    %c0_i32_9 = arith.constant 0 : i32
    %12 = arith.cmpi ne, %11, %c0_i32_9 : i32
    scf.if %12 {
      %c0_10 = arith.constant 0 : index
      %c0_11 = arith.constant 0 : index
      %13 = vector.load %arg6[%c0_10, %c0_11] : memref<16x128xf32, #tpu.memory_space<vmem>>, vector<16x128xf32>
      %c0_12 = arith.constant 0 : index
      %c0_13 = arith.constant 0 : index
      %14 = vector.load %arg5[%c0_12, %c0_13] : memref<16x128xf32, #tpu.memory_space<vmem>>, vector<16x128xf32>
      tpu.vector_store %arg5[%c0_12, %c0_13], %13 {strides = array<i32>} : memref<16x128xf32, #tpu.memory_space<vmem>>, vector<16x128xf32>,
    } else {
    }
    return
  }
  func.func @transform_0(%arg0: i32, %arg1: i32, %arg2: i32) -> (i32, i32) {
    %c0_i32 = arith.constant 0 : i32
    return %arg0, %arg2 : i32, i32
  }
  func.func @transform_1(%arg0: i32, %arg1: i32, %arg2: i32) -> (i32, i32) {
    %c0_i32 = arith.constant 0 : i32
    return %arg2, %arg1 : i32, i32
  }
  func.func @transform_2(%arg0: i32, %arg1: i32, %arg2: i32) -> (i32, i32) {
    %c0_i32 = arith.constant 0 : i32
    return %arg0, %arg1 : i32, i32
  }
}

module attributes {stable_mosaic.version = 11 : i64} {
  func.func @_fused_linear_kernel(%arg0: i32, %arg1: i32, %arg2: i32, %arg3: memref<16x128xbf16, #tpu.memory_space<vmem>>, %arg4: memref<128x128xbf16, #tpu.memory_space<vmem>>, %arg5: memref<1x128xf32, #tpu.memory_space<vmem>>, %arg6: memref<16x128xf32, #tpu.memory_space<vmem>>, %arg7: memref<16x128xf32, #tpu.memory_space<vmem>>, %arg8: memref<16x128xf32, #tpu.memory_space<vmem>>) attributes {dimension_semantics = [#tpu.dimension_semantics<parallel>, #tpu.dimension_semantics<parallel>, #tpu.dimension_semantics<arbitrary>], iteration_bounds = array<i64: 1, 1, 1>, scalar_prefetch = 0 : i64, scratch_operands = 1 : i64, tpu.core_type = #tpu.core_type<tc>, window_params = [{transform_indices = @transform_0, window_bounds = array<i64: 16, 128>}, {transform_indices = @transform_1, window_bounds = array<i64: 128, 128>}, {transform_indices = @transform_2, window_bounds = array<i64: 1, 128>}, {transform_indices = @transform_3, window_bounds = array<i64: 16, 128>}, {transform_indices = @transform_4, window_bounds = array<i64: 16, 128>}]} {
    %c0_i32 = arith.constant 0 : i32
    %0 = arith.cmpi eq, %arg2, %c0_i32 : i32
    %1 = arith.extui %0 : i1 to i32
    %c0_i32_0 = arith.constant 0 : i32
    %2 = arith.cmpi ne, %1, %c0_i32_0 : i32
    scf.if %2 {
      %cst_10 = arith.constant 0.000000e+00 : f32
      %12 = vector.broadcast %cst_10 : f32 to vector<16x128xf32>
      %c0_11 = arith.constant 0 : index
      %c0_12 = arith.constant 0 : index
      %13 = vector.load %arg8[%c0_11, %c0_12] : memref<16x128xf32, #tpu.memory_space<vmem>>, vector<16x128xf32>
      tpu.vector_store %arg8[%c0_11, %c0_12], %12 {strides = array<i32>} : memref<16x128xf32, #tpu.memory_space<vmem>>, vector<16x128xf32>,
    } else {
    }
    %c0 = arith.constant 0 : index
    %c0_1 = arith.constant 0 : index
    %3 = vector.load %arg3[%c0, %c0_1] : memref<16x128xbf16, #tpu.memory_space<vmem>>, vector<16x128xbf16>
    %c0_2 = arith.constant 0 : index
    %c0_3 = arith.constant 0 : index
    %4 = vector.load %arg8[%c0_2, %c0_3] : memref<16x128xf32, #tpu.memory_space<vmem>>, vector<16x128xf32>
    %c0_4 = arith.constant 0 : index
    %c0_5 = arith.constant 0 : index
    %5 = vector.load %arg4[%c0_4, %c0_5] : memref<128x128xbf16, #tpu.memory_space<vmem>>, vector<128x128xbf16>
    %cst = arith.constant dense<0.000000e+00> : vector<16x128xf32>
    %6 = tpu.matmul %3, %5, %cst {dimension_numbers = #tpu.dot_dimension_numbers<[1], [0], [0], [1], [0, 0, 1, 1], [], []>} : vector<16x128xbf16>, vector<128x128xbf16>, vector<16x128xf32> -> vector<16x128xf32>
    %7 = arith.addf %4, %6 : vector<16x128xf32>
    %c0_6 = arith.constant 0 : index
    %c0_7 = arith.constant 0 : index
    %8 = vector.load %arg8[%c0_6, %c0_7] : memref<16x128xf32, #tpu.memory_space<vmem>>, vector<16x128xf32>
    tpu.vector_store %arg8[%c0_6, %c0_7], %7 {strides = array<i32>} : memref<16x128xf32, #tpu.memory_space<vmem>>, vector<16x128xf32>,
    %c0_i32_8 = arith.constant 0 : i32
    %9 = arith.cmpi eq, %arg2, %c0_i32_8 : i32
    %10 = arith.extui %9 : i1 to i32
    %c0_i32_9 = arith.constant 0 : i32
    %11 = arith.cmpi ne, %10, %c0_i32_9 : i32
    scf.if %11 {
      %c0_10 = arith.constant 0 : index
      %c0_11 = arith.constant 0 : index
      %12 = vector.load %arg8[%c0_10, %c0_11] : memref<16x128xf32, #tpu.memory_space<vmem>>, vector<16x128xf32>
      %c0_12 = arith.constant 0 : index
      %c0_13 = arith.constant 0 : index
      %13 = vector.load %arg5[%c0_12, %c0_13] : memref<1x128xf32, #tpu.memory_space<vmem>>, vector<1x128xf32>
      %14 = vector.broadcast %13 : vector<1x128xf32> to vector<16x128xf32>
      %15 = arith.addf %12, %14 : vector<16x128xf32>
      %c0_14 = arith.constant 0 : index
      %c0_15 = arith.constant 0 : index
      %16 = vector.load %arg6[%c0_14, %c0_15] : memref<16x128xf32, #tpu.memory_space<vmem>>, vector<16x128xf32>
      %17 = arith.addf %15, %16 : vector<16x128xf32>
      %c0_16 = arith.constant 0 : index
      %c0_17 = arith.constant 0 : index
      %18 = vector.load %arg7[%c0_16, %c0_17] : memref<16x128xf32, #tpu.memory_space<vmem>>, vector<16x128xf32>
      tpu.vector_store %arg7[%c0_16, %c0_17], %17 {strides = array<i32>} : memref<16x128xf32, #tpu.memory_space<vmem>>, vector<16x128xf32>,
    } else {
    }
    return
  }
  func.func @transform_0(%arg0: i32, %arg1: i32, %arg2: i32) -> (i32, i32) {
    %c0_i32 = arith.constant 0 : i32
    return %arg0, %arg2 : i32, i32
  }
  func.func @transform_1(%arg0: i32, %arg1: i32, %arg2: i32) -> (i32, i32) {
    %c0_i32 = arith.constant 0 : i32
    return %arg2, %arg1 : i32, i32
  }
  func.func @transform_2(%arg0: i32, %arg1: i32, %arg2: i32) -> (i32, i32) {
    %c0_i32 = arith.constant 0 : i32
    %c0_i32_0 = arith.constant 0 : i32
    return %c0_i32, %arg1 : i32, i32
  }
  func.func @transform_3(%arg0: i32, %arg1: i32, %arg2: i32) -> (i32, i32) {
    %c0_i32 = arith.constant 0 : i32
    return %arg0, %arg1 : i32, i32
  }
  func.func @transform_4(%arg0: i32, %arg1: i32, %arg2: i32) -> (i32, i32) {
    %c0_i32 = arith.constant 0 : i32
    return %arg0, %arg1 : i32, i32
  }
}

</mosaic_0001>

<bundles_post_ra>
// kernel: _lambda_.12
= control target key start
LH: loop header
LB: loop body
LE: loop exit
PB: predicated region body
PF: predicated region fallthrough
CT: control target
= control target key end

     0   :  { %s684_s12 = smov 0   ;;  %s686_s13 = smov 0   ;;  %s752_s0 = inlined_call_operand.vmem [shape: bf16[2,4,8,8], index: 0, kind: input, shape index: {}]   ;;  %s753_s1 = inlined_call_operand.vmem [shape: bf16[2,4,8,8], index: 1, kind: input, shape index: {}]   ;;  %s754_s2 = inlined_call_operand.vmem [shape: bf16[2,4,8,8], index: 2, kind: input, shape index: {}]   ;;  %s755_s3 = inlined_call_operand.vmem [shape: bf16[2,4,8,8], index: 3, kind: output, shape index: {}]  }
   0x1   :  { %s688_s14 = smov 0   ;;  %s690_s15 = smov 0  }
   0x2   :  { %s692_s16 = smov 0  }
   0x3 LB: > { %s28_s17 = sadd.s32 1, %s652_s14  ;;  %s32_s18 = sadd.s32 1, %s656_s15  ;;  %s660_s16 = sphi %s692_s16, %s13_s16   ;;  %s656_s15 = sphi %s690_s15, %s759_s15   ;;  %s652_s14 = sphi %s688_s14, %s758_s14   ;;  %s648_s13 = sphi %s686_s13, %s757_s13   ;;  %s644_s12 = sphi %s684_s12, %s756_s12  }
   0x4   : > { %p30_p0 = scmp.ge.s32.totalorder %s28_s17, 4  ;;  %p547_p1 = scmp.ge.s32.totalorder %s660_s16, 1 }
   0x5   : > { %p200_p2 = scmp.lt.s32.totalorder %s660_s16, 9 }
   0x6   : > { %s761_s17 = smov (%p30_p0, %s28_s17), 0  ;;  %s763_s18 = smov (!%p30_p0, %s32_s18), %s656_s15 }
   0x7   : > { %p201_p3 = pnand %p547_p1, %p200_p2  ;;  %p34_p4 = scmp.ge.s32.totalorder %s763_s18, 2 }
   0x8   : > { %p252_p5 = scmp.lt.s32.totalorder (!%p201_p3), %s648_s13, 1  ;;  %p254_p6 = scmp.lt.s32.totalorder (!%p201_p3), %s644_s12, 3 }
   0x9   : > { %s765_s18 = smov (%p34_p4, %s763_s18), 0  ;;  %204 = sbr.rel (%p201_p3) target bundleno = 734 (0x2de), region = 32 }
   0xe   : > { %v662_v0 = vmov 0.0   ;;  %vm663_vm0 = vmmov 0   ;;  %s767_s13 = smov (!%p252_p5, %s648_s13), 1  ;;  %s769_s12 = smov (!%p254_p6, %s644_s12), 3  ;;  %vm296_vm1 = vcmask 64512   ;;  %vm358_vm2 = vcmask 1043456  }
   0xf   : > { %564 = vmatprep.subr.bf16.mxu0 %v662_v0  ;;  %566 = vmatprep.mubr.msk.bf16.mxu0 %vm663_vm0, %v662_v0  ;;  %s548_s19 = sshll.u32 %s767_s13, 2  ;;  %vm403_vm3 = vcmask 60416  }
  0x10   : > { %570 = vmatprep.subr.bf16.mxu1 %v662_v0  ;;  %572 = vmatprep.mubr.msk.bf16.mxu1 %vm663_vm0, %v662_v0  ;;  %s260_s20 = sadd.s32 %s548_s19, %s769_s12 }
  0x11   : > { %s714_s21 = sshll.u32 %s260_s20, 2 }
  0x12   : > { %s270_s24 = scalar_lea.vmem %s753_s1, %s714_s21  ;;  %s262_s27 = scalar_lea.vmem %s752_s0, %s714_s21 }
  0x13   : > { %v294_v1 = vld [vmem:[%s270_s24] sm:$0xf]  ;;  %s278_s30 = scalar_lea.vmem %s754_s2, %s714_s21  ;;  %s289_s6 = scalar_lea.vmem %s755_s3, %s714_s21 }
  0x14   : > { %v301_v2 = vsel %vm296_vm1, %v294_v1, 0  ;;  %v292_v3 = vld [vmem:[%s262_s27] sm:$0xf] }
  0x15   : > { %565 = vmatpush3.bf16.xpose.msra.mxu0 %v301_v2  ;;  %v293_v4 = vmul.bf16 1052065461, %v292_v3  ;;  %v295_v15 = vld [vmem:[%s278_s30] sm:$0xf] }
  0x16   : > { %v360_v16 = vsel %vm358_vm2, %v295_v15, 0 }
  0x17   : > { %571 = vmatpush3.bf16.msra.mxu1 %v360_v16 }
  0x1c   : > { %567 = vmatmul.mubr.msk.bf16.vlgmr.msra.gmra.mxu0 %vm296_vm1, %v293_v4 }
  0xdc   : > { %v337_v5 = vpop.f32.mrf.mxu0 }
  0xdd   : > { %v343_v6 = vsel %vm296_vm1, %v337_v5, -inf }
  0xde   : > { %344 = vmax.xlane.f32.xlu0 %v343_v6  ;;  %v568_v7 = vpop.f32.mrf.mxu0 }
  0xe0   : > { %v340_v8 = vpop.f32.mrf.mxu0 }
  0xe2   : > { %v569_v9 = vpop.f32.mrf.mxu0 }
 0x167   : > { %v345_v10 = vpop.xlane.xlu0 %344 }
 0x168   : > { %v346_v11 = vsub.f32 %v337_v5, %v345_v10 }
 0x16a   : > { %v347_v12 = vmul.f32 1.442695, %v346_v11 }
 0x16c   : > { %618 = vpow2.f32 %v347_v12 }
 0x179   : > { %v619_v13 = vpop.eup %618 }
 0x17a   : > { %v349_v14 = vsel %vm296_vm1, %v619_v13, 0.0 }
 0x17b   : > { %350 = vadd.xlane.f32.xlu0 %v349_v14 }
 0x204   : > { %v351_v17 = vpop.xlane.xlu0 %350 }
 0x205   : > { %620 = vrcp.f32 %v351_v17 }
 0x212   : > { %v621_v18 = vpop.eup %620 }
 0x213   : > { %v353_v19 = vmul.f32 %v621_v18, %v619_v13 }
 0x215   : > { %v354_v20 = vpack.c.bf16 %v353_v19, %v353_v19 }
 0x217   : > { %573 = vmatmul.mubr.msk.bf16.vlgmr.msra.gmra.mxu1 %vm296_vm1, %v354_v20 }
 0x2d7   : > { %v396_v21 = vpop.f32.mrf.mxu1 }
 0x2d8   : > { %v402_v22 = vpack.c.bf16 %v396_v21, %v396_v21 }
 0x2d9   : > { %v574_v23 = vpop.f32.mrf.mxu1 }
 0x2da   : > { %404 = vst.msk [vmem:[%s289_s6] sm:$0xf] %vm403_vm3, %v402_v22 }
 0x2db   : > { %v399_v24 = vpop.f32.mrf.mxu1 }
 0x2dd   : > { %v575_v25 = vpop.f32.mrf.mxu1 }
 0x2de PF: > { %s13_s16 = sadd.s32 1, %s660_s16   ;;  %s756_s12 = smov %s652_s14 }
 0x2df   : > { %p10_p7 = scmp.ge.s32.totalorder %s13_s16, 10   ;;  %s757_s13 = smov %s656_s15 }
 0x2e0   : > { %s758_s14 = smov %s761_s17  ;;  %s759_s15 = smov %s765_s18 }
 0x2e1   :  { %12 = sbr.rel (!%p10_p7) target bundleno = 3 (0x3), region = 68 }

// kernel: _lambda_.11
= control target key start
LH: loop header
LB: loop body
LE: loop exit
PB: predicated region body
PF: predicated region fallthrough
CT: control target
= control target key end

     0   :  { %vm33_vm0 = vcmask 261120   ;;  %v232_v15 = vmov 0.0   ;;  %vm233_vm1 = vmmov 0   ;;  %vm87_vm2 = vcmask 257024   ;;  %s293_s0 = inlined_call_operand.vmem [shape: f32[16,32], index: 0, kind: input, shape index: {}]   ;;  %s294_s1 = inlined_call_operand.vmem [shape: bf16[32,128], index: 1, kind: input, shape index: {}]   ;;  %s295_s2 = inlined_call_operand.vmem [shape: f32[1,32], index: 2, kind: input, shape index: {}]   ;;  %s296_s3 = inlined_call_operand.vmem [shape: f32[1,32], index: 3, kind: input, shape index: {}]   ;;  %s297_s4 = inlined_call_operand.vmem [shape: f32[1,128], index: 4, kind: input, shape index: {}]   ;;  %s298_s5 = inlined_call_operand.vmem [shape: bf16[16,128], index: 5, kind: output, shape index: {}]  }
   0x1   :  { %v31_v0 = vld [vmem:[%s293_s0] sm:$0xff]  ;;  %v32_v1 = vld [vmem:[%s293_s0 + $0x8] sm:$0xff]  ;;  %215 = vmatprep.subr.bf16.mxu0 %v232_v15  ;;  %219 = vmatprep.mubr.msk.bf16.mxu0 %vm233_vm1, %v232_v15 }
   0x2   :  { %v34_v2 = vsel %vm33_vm0, %v31_v0, 0.0  ;;  %v37_v3 = vsel %vm33_vm0, %v32_v1, 0.0  ;;  %v225_v14 = vld [vmem:[%s294_s1 + $0x8] sm:$0xff]   ;;  %v226_v16 = vld [vmem:[%s294_s1] sm:$0xff]  }
   0x3   :  { %35 = vadd.xlane.f32.xlu0 %v34_v2  ;;  %216 = vmatpush3.bf16.msra.mxu0 %v225_v14  ;;  %v192_v24 = vld [vmem:[%s295_s2] ss:$0 sm:$0xff] }
   0x4   :  { %217 = vmatprep.subr.bf16.mxu0 %v232_v15  ;;  %v193_v26 = vld [vmem:[%s296_s3] ss:$0 sm:$0xff] }
   0x5   :  { %v200_v37 = vld [vmem:[%s297_s4] ss:$0 sm:$0xff] }
   0x7   :  { %38 = vadd.xlane.f32.xlu0 %v37_v3  ;;  %218 = vmatpush3.bf16.msra.mxu0 %v226_v16 }
  0x8c   :  { %v36_v4 = vpop.xlane.xlu0 %35 }
  0x8d   :  { %v41_v5 = vmul.f32 0.03125, %v36_v4 }
  0x8f   :  { %v43_v6 = vsub.f32 %v31_v0, %v41_v5 }
  0x90   :  { %v39_v7 = vpop.xlane.xlu0 %38 }
  0x91   :  { %v42_v8 = vmul.f32 0.03125, %v39_v7  ;;  %v45_v9 = vmul.f32 %v43_v6, %v43_v6 }
  0x93   :  { %v44_v10 = vsub.f32 %v32_v1, %v42_v8  ;;  %v47_v11 = vsel %vm33_vm0, %v45_v9, 0.0 }
  0x94   :  { %48 = vadd.xlane.f32.xlu1 %v47_v11 }
  0x95   :  { %v46_v12 = vmul.f32 %v44_v10, %v44_v10 }
  0x97   :  { %v50_v13 = vsel %vm33_vm0, %v46_v12, 0.0 }
  0x98   :  { %51 = vadd.xlane.f32.xlu1 %v50_v13 }
 0x11d   :  { %v49_v17 = vpop.xlane.xlu1 %48 }
 0x11e   :  { %v53_v18 = vmul.f32 0.03125, %v49_v17 }
 0x120   :  { %v55_v19 = vadd.f32 1e-05, %v53_v18 }
 0x121   :  { %v52_v20 = vpop.xlane.xlu1 %51 }
 0x122   :  { %228 = vrsqrt.f32 %v55_v19  ;;  %v54_v21 = vmul.f32 0.03125, %v52_v20 }
 0x124   :  { %v56_v22 = vadd.f32 1e-05, %v54_v21 }
 0x126   :  { %230 = vrsqrt.f32 %v56_v22 }
 0x12f   :  { %v229_v23 = vpop.eup %228 }
 0x130   :  { %v59_v25 = vmul.f32 %v229_v23, %v43_v6 }
 0x132   :  { %v68_v27 = vmul.f32 %v192_v24, %v59_v25 }
 0x133   :  { %v231_v28 = vpop.eup %230 }
 0x134   :  { %v77_v29 = vadd.f32 %v193_v26, %v68_v27  ;;  %v60_v30 = vmul.f32 %v231_v28, %v44_v10 }
 0x136   :  { %v203_v31 = vpack.c.bf16 %v77_v29, %v77_v29  ;;  %v69_v32 = vmul.f32 %v192_v24, %v60_v30 }
 0x138   :  { %88 = vst.msk [vmem:[#allocation3] sm:$0xf] %vm87_vm2, %v203_v31  ;;  %v78_v33 = vadd.f32 %v193_v26, %v69_v32 }
 0x13a   :  { %v204_v34 = vpack.c.bf16 %v78_v33, %v78_v33 }
 0x13c   :  { %89 = vst.msk [vmem:[#allocation3 + $0x4] sm:$0xf] %vm87_vm2, %v204_v34 }
 0x143   :  { %v227_v35 = vld [vmem:[#allocation3] sm:$0xff]  }
 0x144   :  { %220 = vmatmul.mubr.msk.bf16.vlgmr.msra.gmra.mxu0 %vm33_vm0, %v227_v35 }
 0x204   :  { %v153_v36 = vpop.f32.mrf.mxu0 }
 0x205   :  { %v176_v40 = vadd.f32 %v200_v37, %v153_v36 }
 0x206   :  { %v221_v38 = vpop.f32.mrf.mxu0 }
 0x208   :  { %v156_v39 = vpop.f32.mrf.mxu0 }
 0x209   :  { %v177_v41 = vadd.f32 %v200_v37, %v156_v39 }
 0x20a   :  { %v222_v42 = vpop.f32.mrf.mxu0 }
 0x20b   :  { %v210_v43 = vpack.c.bf16 %v177_v41, %v176_v40 }
 0x20d   :  { %211 = vst [vmem:[%s298_s5] sm:$0xff] %v210_v43  }

// kernel: _lambda_.13
= control target key start
LH: loop header
LB: loop body
LE: loop exit
PB: predicated region body
PF: predicated region fallthrough
CT: control target
= control target key end

     0   :  { %v143_v0 = vmov 0.0   ;;  %vm144_vm0 = vmmov 0   ;;  %vm49_vm1 = vcmask 261120   ;;  %s194_s1 = inlined_call_operand.vmem [shape: bf16[32,128], index: 1, kind: input, shape index: {}]   ;;  %s195_s0 = inlined_call_operand.vmem [shape: bf16[16,32], index: 0, kind: input, shape index: {}]   ;;  %s196_s2 = inlined_call_operand.vmem [shape: f32[1,128], index: 2, kind: input, shape index: {}]   ;;  %s197_s3 = inlined_call_operand.vmem [shape: f32[16,128], index: 3, kind: input, shape index: {}]   ;;  %s198_s4 = inlined_call_operand.vmem [shape: f32[16,128], index: 4, kind: output, shape index: {}]  }
   0x1   :  { %130 = vmatprep.subr.bf16.mxu0 %v143_v0  ;;  %v140_v1 = vld [vmem:[%s194_s1 + $0x8] sm:$0xff]   ;;  %134 = vmatprep.mubr.msk.bf16.mxu0 %vm144_vm0, %v143_v0  ;;  %v141_v2 = vld [vmem:[%s194_s1] sm:$0xff]  }
   0x2   :  { %131 = vmatpush3.bf16.msra.mxu0 %v140_v1  ;;  %v142_v3 = vld [vmem:[%s195_s0] sm:$0xff]   ;;  %v113_v11 = vld [vmem:[%s197_s3 + $0x8] sm:$0xff] }
   0x3   :  { %132 = vmatprep.subr.bf16.mxu0 %v143_v0  ;;  %v126_v4 = vld [vmem:[%s196_s2] ss:$0 sm:$0xff] }
   0x4   :  { %v112_v6 = vld [vmem:[%s197_s3] sm:$0xff] }
   0x6   :  { %133 = vmatpush3.bf16.msra.mxu0 %v141_v2 }
   0x9   :  { %135 = vmatmul.mubr.msk.bf16.vlgmr.msra.gmra.mxu0 %vm49_vm1, %v142_v3 }
  0xc9   :  { %v87_v5 = vpop.f32.mrf.mxu0 }
  0xca   :  { %v110_v7 = vadd.f32 %v126_v4, %v87_v5 }
  0xcb   :  { %v136_v8 = vpop.f32.mrf.mxu0 }
  0xcc   :  { %v114_v9 = vadd.f32 %v112_v6, %v110_v7 }
  0xcd   :  { %v90_v10 = vpop.f32.mrf.mxu0 }
  0xce   :  { %116 = vst [vmem:[%s198_s4] sm:$0xff] %v114_v9  ;;  %v111_v12 = vadd.f32 %v126_v4, %v90_v10 }
  0xcf   :  { %v137_v13 = vpop.f32.mrf.mxu0 }
  0xd0   :  { %v115_v14 = vadd.f32 %v113_v11, %v111_v12 }
  0xd2   :  { %117 = vst [vmem:[%s198_s4 + $0x8] sm:$0xff] %v115_v14 }

// kernel: _lambda_.21
= control target key start
LH: loop header
LB: loop body
LE: loop exit
PB: predicated region body
PF: predicated region fallthrough
CT: control target
= control target key end

     0   :  { %v117_v0 = vmov 0.0   ;;  %vm118_vm0 = vmmov 0   ;;  %vm39_vm1 = vcmask 261120   ;;  %s152_s1 = inlined_call_operand.vmem [shape: bf16[32,128], index: 1, kind: input, shape index: {}]   ;;  %s153_s0 = inlined_call_operand.vmem [shape: f32[16,32], index: 0, kind: input, shape index: {}]   ;;  %s154_s2 = inlined_call_operand.vmem [shape: f32[16,128], index: 2, kind: output, shape index: {}]  }
   0x1   :  { %105 = vmatprep.subr.bf16.mxu0 %v117_v0  ;;  %v115_v1 = vld [vmem:[%s152_s1 + $0x8] sm:$0xff]   ;;  %109 = vmatprep.mubr.msk.bf16.mxu0 %vm118_vm0, %v117_v0  ;;  %v116_v2 = vld [vmem:[%s152_s1] sm:$0xff]  }
   0x2   :  { %106 = vmatpush3.bf16.msra.mxu0 %v115_v1  ;;  %v18_v3 = vld [vmem:[%s153_s0] sm:$0xff]  ;;  %v19_v4 = vld [vmem:[%s153_s0 + $0x8] sm:$0xff] }
   0x3   :  { %107 = vmatprep.subr.bf16.mxu0 %v117_v0  ;;  %v20_v5 = vpack.c.bf16 %v19_v4, %v18_v3 }
   0x6   :  { %108 = vmatpush3.bf16.msra.mxu0 %v116_v2 }
   0x9   :  { %110 = vmatmul.mubr.msk.bf16.vlgmr.msra.gmra.mxu0 %vm39_vm1, %v20_v5 }
  0xc9   :  { %v77_v6 = vpop.f32.mrf.mxu0 }
  0xca   :  { %93 = vst [vmem:[%s154_s2] sm:$0xff] %v77_v6 }
  0xcb   :  { %v111_v7 = vpop.f32.mrf.mxu0 }
  0xcd   :  { %v80_v8 = vpop.f32.mrf.mxu0 }
  0xce   :  { %94 = vst [vmem:[%s154_s2 + $0x8] sm:$0xff] %v80_v8 }
  0xcf   :  { %v112_v9 = vpop.f32.mrf.mxu0 }

// kernel: _lambda_.15
= control target key start
LH: loop header
LB: loop body
LE: loop exit
PB: predicated region body
PF: predicated region fallthrough
CT: control target
= control target key end

     0   :  { %v217_v0 = vmov 0.0   ;;  %vm218_vm0 = vmmov 0   ;;  %s286_s1 = inlined_call_operand.vmem [shape: bf16[128,128], index: 1, kind: input, shape index: {}]   ;;  %s287_s0 = inlined_call_operand.vmem [shape: bf16[16,128], index: 0, kind: input, shape index: {}]   ;;  %s288_s2 = inlined_call_operand.vmem [shape: f32[1,128], index: 2, kind: input, shape index: {}]   ;;  %s289_s3 = inlined_call_operand.vmem [shape: f32[16,128], index: 3, kind: input, shape index: {}]   ;;  %s290_s4 = inlined_call_operand.vmem [shape: f32[16,128], index: 4, kind: output, shape index: {}]  }
   0x1   :  { %186 = vmatprep.subr.bf16.mxu0 %v217_v0  ;;  %v208_v1 = vld [vmem:[%s286_s1 + $0x38] sm:$0xff]   ;;  %202 = vmatprep.mubr.msk.bf16.mxu0 %vm218_vm0, %v217_v0  ;;  %v209_v2 = vld [vmem:[%s286_s1 + $0x30] sm:$0xff]   ;;  %v210_v3 = vld [vmem:[%s286_s1 + $0x28] sm:$0xff]  }
   0x2   :  { %187 = vmatpush3.bf16.msra.mxu0 %v208_v1  ;;  %v211_v4 = vld [vmem:[%s286_s1 + $0x20] sm:$0xff]   ;;  %v212_v5 = vld [vmem:[%s286_s1 + $0x18] sm:$0xff]   ;;  %v213_v6 = vld [vmem:[%s286_s1 + $0x10] sm:$0xff]  }
   0x3   :  { %188 = vmatprep.subr.bf16.mxu0 %v217_v0  ;;  %v214_v7 = vld [vmem:[%s286_s1 + $0x8] sm:$0xff]   ;;  %v215_v8 = vld [vmem:[%s286_s1] sm:$0xff]  }
   0x4   :  { %v216_v9 = vld [vmem:[%s287_s0] sm:$0xff]   ;;  %v158_v17 = vld [vmem:[%s289_s3 + $0x8] sm:$0xff] }
   0x5   :  { %v176_v10 = vld [vmem:[%s288_s2] ss:$0 sm:$0xff] }
   0x6   :  { %189 = vmatpush3.bf16.msra.mxu0 %v209_v2  ;;  %v157_v12 = vld [vmem:[%s289_s3] sm:$0xff] }
   0x7   :  { %190 = vmatprep.subr.bf16.mxu0 %v217_v0 }
   0xa   :  { %191 = vmatpush3.bf16.msra.mxu0 %v210_v3 }
   0xb   :  { %192 = vmatprep.subr.bf16.mxu0 %v217_v0 }
   0xe   :  { %193 = vmatpush3.bf16.msra.mxu0 %v211_v4 }
   0xf   :  { %194 = vmatprep.subr.bf16.mxu0 %v217_v0 }
  0x12   :  { %195 = vmatpush3.bf16.msra.mxu0 %v212_v5 }
  0x13   :  { %196 = vmatprep.subr.bf16.mxu0 %v217_v0 }
  0x16   :  { %197 = vmatpush3.bf16.msra.mxu0 %v213_v6 }
  0x17   :  { %198 = vmatprep.subr.bf16.mxu0 %v217_v0 }
  0x1a   :  { %199 = vmatpush3.bf16.msra.mxu0 %v214_v7 }
  0x1b   :  { %200 = vmatprep.subr.bf16.mxu0 %v217_v0 }
  0x1e   :  { %201 = vmatpush3.bf16.msra.mxu0 %v215_v8 }
  0x21   :  { %203 = vmatmul.mubr.bf16.vlgmr.msra.gmra.mxu0 %v216_v9 }
  0xe1   :  { %v132_v11 = vpop.f32.mrf.mxu0 }
  0xe2   :  { %v155_v13 = vadd.f32 %v176_v10, %v132_v11 }
  0xe3   :  { %v204_v14 = vpop.f32.mrf.mxu0 }
  0xe4   :  { %v159_v15 = vadd.f32 %v157_v12, %v155_v13 }
  0xe5   :  { %v135_v16 = vpop.f32.mrf.mxu0 }
  0xe6   :  { %161 = vst [vmem:[%s290_s4] sm:$0xff] %v159_v15  ;;  %v156_v18 = vadd.f32 %v176_v10, %v135_v16 }
  0xe7   :  { %v205_v19 = vpop.f32.mrf.mxu0 }
  0xe8   :  { %v160_v20 = vadd.f32 %v158_v17, %v156_v18 }
  0xea   :  { %162 = vst [vmem:[%s290_s4 + $0x8] sm:$0xff] %v160_v20 }

// kernel: _lambda_.14
= control target key start
LH: loop header
LB: loop body
LE: loop exit
PB: predicated region body
PF: predicated region fallthrough
CT: control target
= control target key end

     0   :  { %vm33_vm0 = vcmask 261120   ;;  %v254_v15 = vmov 0.0   ;;  %vm255_vm1 = vmmov 0   ;;  %vm87_vm2 = vcmask 257024   ;;  %s315_s0 = inlined_call_operand.vmem [shape: f32[16,32], index: 0, kind: input, shape index: {}]   ;;  %s316_s1 = inlined_call_operand.vmem [shape: bf16[32,128], index: 1, kind: input, shape index: {}]   ;;  %s317_s2 = inlined_call_operand.vmem [shape: f32[1,32], index: 2, kind: input, shape index: {}]   ;;  %s318_s3 = inlined_call_operand.vmem [shape: f32[1,32], index: 3, kind: input, shape index: {}]   ;;  %s319_s4 = inlined_call_operand.vmem [shape: f32[1,128], index: 4, kind: input, shape index: {}]   ;;  %s320_s5 = inlined_call_operand.vmem [shape: bf16[16,128], index: 5, kind: output, shape index: {}]  }
   0x1   :  { %v31_v0 = vld [vmem:[%s315_s0] sm:$0xff]  ;;  %v32_v1 = vld [vmem:[%s315_s0 + $0x8] sm:$0xff]  ;;  %233 = vmatprep.subr.bf16.mxu0 %v254_v15  ;;  %237 = vmatprep.mubr.msk.bf16.mxu0 %vm255_vm1, %v254_v15 }
   0x2   :  { %v34_v2 = vsel %vm33_vm0, %v31_v0, 0.0  ;;  %v37_v3 = vsel %vm33_vm0, %v32_v1, 0.0  ;;  %v243_v14 = vld [vmem:[%s316_s1 + $0x8] sm:$0xff]   ;;  %v244_v16 = vld [vmem:[%s316_s1] sm:$0xff]  }
   0x3   :  { %35 = vadd.xlane.f32.xlu0 %v34_v2  ;;  %234 = vmatpush3.bf16.msra.mxu0 %v243_v14  ;;  %v210_v24 = vld [vmem:[%s317_s2] ss:$0 sm:$0xff] }
   0x4   :  { %235 = vmatprep.subr.bf16.mxu0 %v254_v15  ;;  %v211_v26 = vld [vmem:[%s318_s3] ss:$0 sm:$0xff] }
   0x5   :  { %v218_v36 = vld [vmem:[%s319_s4] ss:$0 sm:$0xff] }
   0x7   :  { %38 = vadd.xlane.f32.xlu0 %v37_v3  ;;  %236 = vmatpush3.bf16.msra.mxu0 %v244_v16 }
  0x8c   :  { %v36_v4 = vpop.xlane.xlu0 %35 }
  0x8d   :  { %v41_v5 = vmul.f32 0.03125, %v36_v4 }
  0x8f   :  { %v43_v6 = vsub.f32 %v31_v0, %v41_v5 }
  0x90   :  { %v39_v7 = vpop.xlane.xlu0 %38 }
  0x91   :  { %v42_v8 = vmul.f32 0.03125, %v39_v7  ;;  %v45_v9 = vmul.f32 %v43_v6, %v43_v6 }
  0x93   :  { %v44_v10 = vsub.f32 %v32_v1, %v42_v8  ;;  %v47_v11 = vsel %vm33_vm0, %v45_v9, 0.0 }
  0x94   :  { %48 = vadd.xlane.f32.xlu1 %v47_v11 }
  0x95   :  { %v46_v12 = vmul.f32 %v44_v10, %v44_v10 }
  0x97   :  { %v50_v13 = vsel %vm33_vm0, %v46_v12, 0.0 }
  0x98   :  { %51 = vadd.xlane.f32.xlu1 %v50_v13 }
 0x11d   :  { %v49_v17 = vpop.xlane.xlu1 %48 }
 0x11e   :  { %v53_v18 = vmul.f32 0.03125, %v49_v17 }
 0x120   :  { %v55_v19 = vadd.f32 1e-05, %v53_v18 }
 0x121   :  { %v52_v20 = vpop.xlane.xlu1 %51 }
 0x122   :  { %246 = vrsqrt.f32 %v55_v19  ;;  %v54_v21 = vmul.f32 0.03125, %v52_v20 }
 0x124   :  { %v56_v22 = vadd.f32 1e-05, %v54_v21 }
 0x126   :  { %248 = vrsqrt.f32 %v56_v22 }
 0x12f   :  { %v247_v23 = vpop.eup %246 }
 0x130   :  { %v59_v25 = vmul.f32 %v247_v23, %v43_v6 }
 0x132   :  { %v68_v27 = vmul.f32 %v210_v24, %v59_v25 }
 0x133   :  { %v249_v28 = vpop.eup %248 }
 0x134   :  { %v77_v29 = vadd.f32 %v211_v26, %v68_v27  ;;  %v60_v30 = vmul.f32 %v249_v28, %v44_v10 }
 0x136   :  { %v221_v31 = vpack.c.bf16 %v77_v29, %v77_v29  ;;  %v69_v32 = vmul.f32 %v210_v24, %v60_v30 }
 0x138   :  { %88 = vst.msk [vmem:[#allocation3] sm:$0xf] %vm87_vm2, %v221_v31  ;;  %v78_v33 = vadd.f32 %v211_v26, %v69_v32 }
 0x13a   :  { %v222_v34 = vpack.c.bf16 %v78_v33, %v78_v33 }
 0x13c   :  { %89 = vst.msk [vmem:[#allocation3 + $0x4] sm:$0xf] %vm87_vm2, %v222_v34 }
 0x143   :  { %v245_v35 = vld [vmem:[#allocation3] sm:$0xff]  }
 0x144   :  { %238 = vmatmul.mubr.msk.bf16.vlgmr.msra.gmra.mxu0 %vm33_vm0, %v245_v35 }
 0x204   :  { %v153_v37 = vpop.f32.mrf.mxu0 }
 0x205   :  { %v176_v38 = vadd.f32 %v218_v36, %v153_v37 }
 0x206   :  { %v239_v39 = vpop.f32.mrf.mxu0 }
 0x207   :  { %v178_v40 = vmul.f32 %v176_v38, %v176_v38 }
 0x208   :  { %v156_v41 = vpop.f32.mrf.mxu0 }
 0x209   :  { %v180_v42 = vmul.f32 %v178_v40, %v176_v38  ;;  %v177_v43 = vadd.f32 %v218_v36, %v156_v41 }
 0x20a   :  { %v240_v44 = vpop.f32.mrf.mxu0 }
 0x20b   :  { %v182_v45 = vmul.f32 0.044715, %v180_v42  ;;  %v179_v46 = vmul.f32 %v177_v43, %v177_v43 }
 0x20d   :  { %v184_v47 = vadd.f32 %v182_v45, %v176_v38  ;;  %v181_v48 = vmul.f32 %v179_v46, %v177_v43 }
 0x20f   :  { %v186_v49 = vmul.f32 0.7978846, %v184_v47  ;;  %v183_v50 = vmul.f32 0.044715, %v181_v48 }
 0x211   :  { %250 = vtanh.f32 %v186_v49  ;;  %v185_v51 = vadd.f32 %v183_v50, %v177_v43 }
 0x213   :  { %v187_v52 = vmul.f32 0.7978846, %v185_v51 }
 0x215   :  { %252 = vtanh.f32 %v187_v52 }
 0x21e   :  { %v251_v53 = vpop.eup %250 }
 0x21f   :  { %v190_v54 = vadd.f32 1.0, %v251_v53 }
 0x221   :  { %v192_v56 = vmul.f32 0.5, %v190_v54 }
 0x222   :  { %v253_v55 = vpop.eup %252 }
 0x223   :  { %v191_v57 = vadd.f32 1.0, %v253_v55  ;;  %v194_v59 = vmul.f32 %v192_v56, %v176_v38 }
 0x225   :  { %v193_v58 = vmul.f32 0.5, %v191_v57 }
 0x227   :  { %v195_v60 = vmul.f32 %v193_v58, %v177_v43 }
 0x229   :  { %v228_v61 = vpack.c.bf16 %v195_v60, %v194_v59 }
 0x22b   :  { %229 = vst [vmem:[%s320_s5] sm:$0xff] %v228_v61  }

</bundles_post_ra>
